<compile_context>
chip_gen: v7x
topology: tpu7x:2x2x1
jax: 0.10.0
libtpu: 0.0.40
codegen_flags: <defaults>
</compile_context>

<pallas_src>
import functools

import numpy as np
import jax
import jax.numpy as jnp
from jax.experimental import pallas as pl
from jax.experimental.pallas import tpu as pltpu

# ---- module "args" (deterministic, mirrors Communication.__init__) ---------
THRESHOLD = 0.01
K_SIZE = 5        # args['gaussian_smooth']['k_size']
C_SIGMA = 1.0     # args['gaussian_smooth']['c_sigma']


def _gaussian_1d(k_size=K_SIZE, sigma=C_SIGMA):
    """1-D factor of Communication.init_gaussian_filter's 2-D kernel.

    g2d[di, dj] = 1/(2*pi*sigma) * exp(-(x^2 + y^2) / (2*sigma^2))
                = g1[di] * g1[dj]   with the normalisation split evenly.
    """
    center = k_size // 2
    d = np.arange(k_size, dtype=np.float64) - center
    g = np.exp(-np.square(d) / (2.0 * sigma ** 2))
    return (np.sqrt(1.0 / (2.0 * np.pi * sigma)) * g).astype(np.float32)


def _banded(n, g1d):
    """Symmetric banded (n, n) operator: out[a, b] = g1d[a - b + P], |a-b| <= P."""
    p = g1d.shape[0] // 2
    idx = np.arange(n)
    d = idx[:, None] - idx[None, :]
    out = np.zeros((n, n), np.float32)
    m = np.abs(d) <= p
    out[m] = g1d[(d + p)[m]]
    return out


@functools.lru_cache(maxsize=None)
def _operators(H, W, Nb):
    """Conv / segment operators, cached per (H, W, Nb); built with vectorized numpy."""
    g1 = _gaussian_1d()
    kw = _banded(W, g1)                                        # (W, W)   W-direction
    kh = _banded(H, g1)                                        # (H, H)   H-direction
    lh = np.kron(np.eye(Nb, dtype=np.float32), kh)             # (Nb*H, Nb*H) block-diag
    seg = np.kron(np.eye(Nb, dtype=np.float32),
                  np.ones((1, H), np.float32))                 # (Nb, Nb*H) agent-sum op
    return kw, lh, seg


def _comm_kernel(kw_ref, lh_ref, seg_ref, conf_ref, mask_ref, sums_ref):
    """One block of Nb agents, stacked as (Nb*H) rows x W cols.

    kw_ref   : (W, W)          banded W-direction conv operator (right operand)
    lh_ref   : (Nb*H, Nb*H)    block-diagonal H-direction conv operator (left operand)
    seg_ref  : (Nb, Nb*H)      0/1 per-agent row-segment matrix
    conf_ref : (C, Nb*H, W)    confidence logits (channel-first)
    mask_ref : (1, Nb*H, W)    binary communication masks (float32)
    sums_ref : (1, Nb, 1)      per-agent mask sums (float32)
    """
    # sigmoid(max over channels) == max(sigmoid(.)) over channels (monotonic);
    # channel-first layout -> elementwise VPU max over C resident vregs.
    logits = jnp.max(conf_ref[...], axis=0)                        # (Nb*H, W)
    cmap = jax.nn.sigmoid(logits.astype(jnp.float32))              # (Nb*H, W)  EUP

    # frozen gaussian 'same' conv (bias = 0), exactly separable, both passes MXU:
    #   W direction: right-multiply by the banded (W, W) operator
    #   H direction: left-multiply by the per-agent block-diagonal operator
    s = jnp.dot(cmap, kw_ref[...], preferred_element_type=jnp.float32)        # (Nb*H, W)
    smoothed = jnp.dot(lh_ref[...], s, preferred_element_type=jnp.float32)    # (Nb*H, W)

    # eval / threshold branch: torch.where(maps > threshold, 1, 0)
    mask = jnp.where(smoothed > THRESHOLD, 1.0, 0.0).astype(jnp.float32)
    mask_ref[0] = mask

    # fused per-agent mask sums (rates computed BEFORE the mask[0]=1 override),
    # avoids an extra HBM read of the masks in the wrapper.
    per_agent = jnp.dot(seg_ref[...], mask, preferred_element_type=jnp.float32)  # (Nb, W)
    sums_ref[0] = jnp.sum(per_agent, axis=-1, keepdims=True)        # (Nb, 1)


def _round_up(x, m):
    return ((x + m - 1) // m) * m


@functools.partial(jax.jit, static_argnums=(1, 2))
def _forward_impl(conf, Ls, B):
    """conf: (N, C, H, W) float32 with N = sum(Ls); Ls, B static."""
    N, C, H, W = conf.shape

    # All agents in a single grid step when small (Nb >= 8 for fp32 sublane fill),
    # otherwise blocks of 32 agents.
    Nb = _round_up(N, 8) if N <= 32 else 32
    N_pad = _round_up(N, Nb)
    num_blocks = N_pad // Nb

    kw_np, lh_np, seg_np = _operators(H, W, Nb)
    kw = jnp.asarray(kw_np)
    lh = jnp.asarray(lh_np)
    seg = jnp.asarray(seg_np)

    # Channel-first, agents*H stacked on the sublane axis, W on the lane axis.
    conf_cm = jnp.transpose(conf.astype(jnp.float32), (1, 0, 2, 3)).reshape(C, N * H, W)
    if N_pad > N:
        conf_cm = jnp.pad(conf_cm, ((0, 0), (0, (N_pad - N) * H), (0, 0)))

    flops = int(2 * N_pad * H * W * W
                + 2 * num_blocks * (Nb * H) * (Nb * H) * W
                + 2 * num_blocks * Nb * (Nb * H) * W)
    transcendentals = int(N_pad * H * W)
    bytes_accessed = int(4 * (C * N_pad * H * W + N_pad * H * W + N_pad
                              + W * W + (Nb * H) ** 2 + Nb * Nb * H))

    # NOTE: the constant-index operators (kw/lh/seg) are tiny after the separable
    # rewrite ((W^2 + (Nb*H)^2) * 4B), so default double-buffering is harmless and
    # no explicit vmem_limit_bytes is needed.
    masks_blk, sums_blk = pl.pallas_call(
        _comm_kernel,
        out_shape=(
            jax.ShapeDtypeStruct((num_blocks, Nb * H, W), jnp.float32),
            jax.ShapeDtypeStruct((num_blocks, Nb, 1), jnp.float32),
        ),
        grid_spec=pltpu.PrefetchScalarGridSpec(
            num_scalar_prefetch=0,
            grid=(num_blocks,),
            in_specs=[
                pl.BlockSpec((W, W), lambda n: (0, 0)),                # W conv operator
                pl.BlockSpec((Nb * H, Nb * H), lambda n: (0, 0)),      # H conv operator
                pl.BlockSpec((Nb, Nb * H), lambda n: (0, 0)),          # agent-sum operator
                pl.BlockSpec((C, Nb * H, W), lambda n: (0, n, 0)),     # Nb agents / step
            ],
            out_specs=[
                pl.BlockSpec((1, Nb * H, W), lambda n: (n, 0, 0)),
                pl.BlockSpec((1, Nb, 1), lambda n: (n, 0, 0)),
            ],
        ),
        compiler_params=pltpu.CompilerParams(
            dimension_semantics=("parallel",) if num_blocks > 1 else ("arbitrary",)),
        cost_estimate=pl.CostEstimate(
            flops=flops, transcendentals=transcendentals,
            bytes_accessed=bytes_accessed),
    )(kw, lh, seg, conf_cm)

    masks_flat = masks_blk.reshape(N_pad, H * W)[:N]              # (N, HW)
    per_agent_sums = sums_blk.reshape(N_pad)[:N]                  # (N,)

    # per-batch communication rates (computed BEFORE mask[0] = 1), vectorized
    seg_ids = jnp.asarray(np.repeat(np.arange(len(Ls)), Ls).astype(np.int32))
    seg_sums = jax.ops.segment_sum(per_agent_sums, seg_ids, num_segments=B)
    denom = jnp.asarray([l * H * W for l in Ls], dtype=jnp.float32)
    communication_rates = jnp.sum(seg_sums / denom) / B

    # first agent of each batch always transmits everything (single scatter)
    first_idx = np.concatenate([[0], np.cumsum(Ls)[:-1]]).astype(np.int32)
    masks_flat = masks_flat.at[jnp.asarray(first_idx)].set(1.0)

    communication_masks = masks_flat.reshape(N, 1, H, W)
    return communication_masks, communication_rates


def communication_forward(batch_confidence_maps, B):
    """JAX/Pallas equivalent of Communication.forward (eval mode).

    batch_confidence_maps: list of B arrays, each (L_b, C, H, W)
    Returns (communication_masks (sum(L_b), 1, H, W), communication_rates scalar)
    """
    Ls = tuple(int(m.shape[0]) for m in batch_confidence_maps)
    conf = jnp.concatenate(
        [jnp.asarray(m, jnp.float32) for m in batch_confidence_maps], axis=0)
    return _forward_impl(conf, Ls, int(B))


# ---- pure-JAX reference (mirrors the PyTorch module) ------------------------
def _reference(batch_confidence_maps, B):
    center = K_SIZE // 2
    x, y = np.mgrid[0 - center:K_SIZE - center, 0 - center:K_SIZE - center]
    g2d = (1.0 / (2.0 * np.pi * C_SIGMA)
           * np.exp(-(np.square(x) + np.square(y))
                    / (2.0 * np.square(C_SIGMA)))).astype(np.float32)
    w = jnp.asarray(g2d)[None, None]                              # (1, 1, K, K)
    masks, rates = [], []
    for b in range(B):
        cm = jax.nn.sigmoid(jnp.asarray(batch_confidence_maps[b], jnp.float32))
        ori = jnp.max(cm, axis=1, keepdims=True)                  # (L, 1, H, W)
        sm = jax.lax.conv_general_dilated(
            ori, w, window_strides=(1, 1), padding="SAME",
            dimension_numbers=("NCHW", "OIHW", "NCHW"))
        L, _, H, W = sm.shape
        mask = jnp.where(sm > THRESHOLD, 1.0, 0.0)
        rates.append(jnp.sum(mask) / (L * H * W))
        mask = mask.at[0].set(1.0)
        masks.append(mask)
    return jnp.concatenate(masks, axis=0), sum(rates) / B


if __name__ == "__main__":
    key = jax.random.PRNGKey(0)
    B = 2
    C, H, W = 4, 16, 16
    Ls = [2, 3]                                       # agents per batch sample
    keys = jax.random.split(key, B)
    batch_confidence_maps = [
        jax.random.normal(keys[b], (Ls[b], C, H, W), dtype=jnp.float32)
        for b in range(B)
    ]

    masks, rates = communication_forward(batch_confidence_maps, B)
    masks = jax.block_until_ready(masks)
    rates = jax.block_until_ready(rates)

    assert masks.shape == (sum(Ls), 1, H, W)
    assert masks.dtype == jnp.float32
    # masks are strictly binary and the first agent of each batch is all ones
    assert bool(jnp.all((masks == 0.0) | (masks == 1.0)))
    assert bool(jnp.all(masks[0] == 1.0)) and bool(jnp.all(masks[Ls[0]] == 1.0))
    assert bool(jnp.isfinite(rates))

    # numerical check against the pure-JAX reference of the PyTorch module
    ref_masks, ref_rates = _reference(batch_confidence_maps, B)
    np.testing.assert_allclose(np.asarray(masks), np.asarray(ref_masks),
                               rtol=0.0, atol=0.0)
    np.testing.assert_allclose(float(rates), float(ref_rates), rtol=1e-6, atol=1e-6)

    print("KERNEL_OK")
</pallas_src>

<mosaic_0001>
module attributes {stable_mosaic.version = 11 : i64} {
  func.func @_comm_kernel(%arg0: i32, %arg1: memref<16x16xf32, #tpu.memory_space<vmem>>, %arg2: memref<128x128xf32, #tpu.memory_space<vmem>>, %arg3: memref<8x128xf32, #tpu.memory_space<vmem>>, %arg4: memref<4x128x16xf32, #tpu.memory_space<vmem>>, %arg5: memref<1x128x16xf32, #tpu.memory_space<vmem>>, %arg6: memref<1x8x1xf32, #tpu.memory_space<vmem>>) attributes {dimension_semantics = [#tpu.dimension_semantics<arbitrary>], iteration_bounds = array<i64: 1>, scalar_prefetch = 0 : i64, scratch_operands = 0 : i64, tpu.core_type = #tpu.core_type<tc>, window_params = [{pipeline_mode = #tpu.pipeline_mode<synchronous>, transform_indices = @transform_0, window_bounds = array<i64: 16, 16>}, {pipeline_mode = #tpu.pipeline_mode<synchronous>, transform_indices = @transform_1, window_bounds = array<i64: 128, 128>}, {pipeline_mode = #tpu.pipeline_mode<synchronous>, transform_indices = @transform_2, window_bounds = array<i64: 8, 128>}, {transform_indices = @transform_3, window_bounds = array<i64: 4, 128, 16>}, {transform_indices = @transform_4, window_bounds = array<i64: 1, 128, 16>}, {transform_indices = @transform_5, window_bounds = array<i64: 1, 8, 1>}]} {
    %c0 = arith.constant 0 : index
    %c0_0 = arith.constant 0 : index
    %c0_1 = arith.constant 0 : index
    %0 = vector.load %arg4[%c0, %c0_0, %c0_1] : memref<4x128x16xf32, #tpu.memory_space<vmem>>, vector<4x128x16xf32>
    %cst = arith.constant dense<0xFF800000> : vector<128x16xf32>
    %1 = vector.multi_reduction <maximumf>, %0, %cst [0] : vector<4x128x16xf32> to vector<128x16xf32>
    %2 = arith.negf %1 : vector<128x16xf32>
    %3 = math.exp %2 : vector<128x16xf32>
    %cst_2 = arith.constant 1.000000e+00 : f32
    %4 = vector.broadcast %cst_2 : f32 to vector<128x16xf32>
    %5 = arith.addf %4, %3 : vector<128x16xf32>
    %6 = arith.divf %4, %5 : vector<128x16xf32>
    %c0_3 = arith.constant 0 : index
    %c0_4 = arith.constant 0 : index
    %7 = vector.load %arg1[%c0_3, %c0_4] : memref<16x16xf32, #tpu.memory_space<vmem>>, vector<16x16xf32>
    %cst_5 = arith.constant dense<0.000000e+00> : vector<128x16xf32>
    %8 = tpu.matmul %6, %7, %cst_5 {dimension_numbers = #tpu.dot_dimension_numbers<[1], [0], [0], [1], [0, 0, 1, 1], [], []>} : vector<128x16xf32>, vector<16x16xf32>, vector<128x16xf32> -> vector<128x16xf32>
    %c0_6 = arith.constant 0 : index
    %c0_7 = arith.constant 0 : index
    %9 = vector.load %arg2[%c0_6, %c0_7] : memref<128x128xf32, #tpu.memory_space<vmem>>, vector<128x128xf32>
    %cst_8 = arith.constant dense<0.000000e+00> : vector<128x16xf32>
    %10 = tpu.matmul %9, %8, %cst_8 {dimension_numbers = #tpu.dot_dimension_numbers<[1], [0], [0], [1], [0, 0, 1, 1], [], []>} : vector<128x128xf32>, vector<128x16xf32>, vector<128x16xf32> -> vector<128x16xf32>
    %cst_9 = arith.constant 0.00999999977 : f32
    %11 = vector.broadcast %cst_9 : f32 to vector<128x16xf32>
    %12 = arith.cmpf ogt, %10, %11 : vector<128x16xf32>
    %cst_10 = arith.constant 1.000000e+00 : f32
    %cst_11 = arith.constant 0.000000e+00 : f32
    %13 = vector.broadcast %cst_10 : f32 to vector<128x16xf32>
    %14 = vector.broadcast %cst_11 : f32 to vector<128x16xf32>
    %15 = arith.select %12, %13, %14 : vector<128x16xi1>, vector<128x16xf32>
    %c0_12 = arith.constant 0 : index
    %c0_13 = arith.constant 0 : index
    %c0_14 = arith.constant 0 : index
    %16 = vector.load %arg5[%c0_12, %c0_13, %c0_14] : memref<1x128x16xf32, #tpu.memory_space<vmem>>, vector<1x128x16xf32>
    %17 = vector.shape_cast %16 : vector<1x128x16xf32> to vector<128x16xf32>
    %18 = vector.shape_cast %15 : vector<128x16xf32> to vector<1x128x16xf32>
    tpu.vector_store %arg5[%c0_12, %c0_13, %c0_14], %18 {strides = array<i32>} : memref<1x128x16xf32, #tpu.memory_space<vmem>>, vector<1x128x16xf32>,
    %c0_15 = arith.constant 0 : index
    %c0_16 = arith.constant 0 : index
    %19 = vector.load %arg3[%c0_15, %c0_16] : memref<8x128xf32, #tpu.memory_space<vmem>>, vector<8x128xf32>
    %cst_17 = arith.constant dense<0.000000e+00> : vector<8x16xf32>
    %20 = tpu.matmul %19, %15, %cst_17 {dimension_numbers = #tpu.dot_dimension_numbers<[1], [0], [0], [1], [0, 0, 1, 1], [], []>} : vector<8x128xf32>, vector<128x16xf32>, vector<8x16xf32> -> vector<8x16xf32>
    %cst_18 = arith.constant dense<0.000000e+00> : vector<8xf32>
    %21 = vector.multi_reduction <add>, %20, %cst_18 [1] : vector<8x16xf32> to vector<8xf32>
    %22 = vector.shape_cast %21 : vector<8xf32> to vector<8x1xf32>
    %c0_19 = arith.constant 0 : index
    %c0_20 = arith.constant 0 : index
    %c0_21 = arith.constant 0 : index
    %23 = vector.load %arg6[%c0_19, %c0_20, %c0_21] : memref<1x8x1xf32, #tpu.memory_space<vmem>>, vector<1x8x1xf32>
    %24 = vector.shape_cast %23 : vector<1x8x1xf32> to vector<8x1xf32>
    %25 = vector.shape_cast %22 : vector<8x1xf32> to vector<1x8x1xf32>
    tpu.vector_store %arg6[%c0_19, %c0_20, %c0_21], %25 {strides = array<i32>} : memref<1x8x1xf32, #tpu.memory_space<vmem>>, vector<1x8x1xf32>,
    return
  }
  func.func @transform_0(%arg0: i32) -> (i32, i32) {
    %c0_i32 = arith.constant 0 : i32
    %c0_i32_0 = arith.constant 0 : i32
    %c0_i32_1 = arith.constant 0 : i32
    return %c0_i32, %c0_i32_0 : i32, i32
  }
  func.func @transform_1(%arg0: i32) -> (i32, i32) {
    %c0_i32 = arith.constant 0 : i32
    %c0_i32_0 = arith.constant 0 : i32
    %c0_i32_1 = arith.constant 0 : i32
    return %c0_i32, %c0_i32_0 : i32, i32
  }
  func.func @transform_2(%arg0: i32) -> (i32, i32) {
    %c0_i32 = arith.constant 0 : i32
    %c0_i32_0 = arith.constant 0 : i32
    %c0_i32_1 = arith.constant 0 : i32
    return %c0_i32, %c0_i32_0 : i32, i32
  }
  func.func @transform_3(%arg0: i32) -> (i32, i32, i32) {
    %c0_i32 = arith.constant 0 : i32
    %c0_i32_0 = arith.constant 0 : i32
    %c0_i32_1 = arith.constant 0 : i32
    return %c0_i32, %arg0, %c0_i32_0 : i32, i32, i32
  }
  func.func @transform_4(%arg0: i32) -> (i32, i32, i32) {
    %c0_i32 = arith.constant 0 : i32
    %c0_i32_0 = arith.constant 0 : i32
    %c0_i32_1 = arith.constant 0 : i32
    return %arg0, %c0_i32, %c0_i32_0 : i32, i32, i32
  }
  func.func @transform_5(%arg0: i32) -> (i32, i32, i32) {
    %c0_i32 = arith.constant 0 : i32
    %c0_i32_0 = arith.constant 0 : i32
    %c0_i32_1 = arith.constant 0 : i32
    return %arg0, %c0_i32, %c0_i32_0 : i32, i32, i32
  }
}

</mosaic_0001>

<bundles_post_ra>
// kernel: _forward_impl.1
= control target key start
LH: loop header
LB: loop body
LE: loop exit
PB: predicated region body
PF: predicated region fallthrough
CT: control target
= control target key end

     0   :  { %vm83_vm0 = vcmask 130048   ;;  %vm1143_vm1 = vmmov 0   ;;  %s1606_s0 = inlined_call_operand.vmem [shape: f32[16,16], index: 0, kind: input, shape index: {}]   ;;  %s1607_s3 = inlined_call_operand.vmem [shape: f32[4,128,16], index: 3, kind: input, shape index: {}]   ;;  %s1608_s1 = inlined_call_operand.vmem [shape: f32[128,128], index: 1, kind: input, shape index: {}]   ;;  %s1609_s4 = inlined_call_operand.vmem [shape: f32[1,128,16], index: 4, kind: output, shape index: {0}]   ;;  %s1610_s2 = inlined_call_operand.vmem [shape: f32[8,128], index: 2, kind: input, shape index: {}]   ;;  %s1611_s5 = inlined_call_operand.vmem [shape: f32[1,8,1], index: 5, kind: output, shape index: {1}]  }
   0x1   :  { %v292_v0 = vld [vmem:[%s1606_s0] sm:$0xff]  ;;  %v293_v1 = vld [vmem:[%s1606_s0 + $0x8] sm:$0xff]  ;;  %v21_v19 = vld [vmem:[%s1607_s3 + $0x10] sm:$0xff] }
   0x2   :  { %v19_v2 = vld [vmem:[%s1607_s3] sm:$0xff]  ;;  %v1014_v3 = vpack.c.bf16 %v293_v1, %v292_v0  ;;  %v20_v11 = vld [vmem:[%s1607_s3 + $0x8] sm:$0xff]  ;;  %v37_v20 = vld [vmem:[%s1607_s3 + $0x90] sm:$0xff]  ;;  %v98_v25 = vsel %vm83_vm0, %v21_v19, -inf }
   0x3   :  { %v35_v4 = vld [vmem:[%s1607_s3 + $0x80] sm:$0xff]  ;;  %v84_v7 = vsel %vm83_vm0, %v19_v2, -inf  ;;  %v36_v12 = vld [vmem:[%s1607_s3 + $0x88] sm:$0xff]  ;;  %v91_v16 = vsel %vm83_vm0, %v20_v11, -inf  ;;  %v53_v23 = vld [vmem:[%s1607_s3 + $0x110] sm:$0xff]  ;;  %v99_v26 = vsel %vm83_vm0, %v37_v20, -inf }
   0x4   :  { %v51_v5 = vld [vmem:[%s1607_s3 + $0x100] sm:$0xff]  ;;  %v85_v8 = vsel %vm83_vm0, %v35_v4, -inf  ;;  %v52_v13 = vld [vmem:[%s1607_s3 + $0x108] sm:$0xff]  ;;  %1015 = vmatprep.subr.bf16.mxu0 %v1014_v3  ;;  %v92_v17 = vsel %vm83_vm0, %v36_v12, -inf  ;;  %v69_v24 = vld [vmem:[%s1607_s3 + $0x190] sm:$0xff]  ;;  %v100_v29 = vmax.f32 %v98_v25, %v99_v26  ;;  %v101_v30 = vsel %vm83_vm0, %v53_v23, -inf }
   0x5   :  { %v67_v6 = vld [vmem:[%s1607_s3 + $0x180] sm:$0xff]  ;;  %v87_v9 = vsel %vm83_vm0, %v51_v5, -inf  ;;  %v86_v14 = vmax.f32 %v84_v7, %v85_v8  ;;  %v68_v15 = vld [vmem:[%s1607_s3 + $0x188] sm:$0xff]  ;;  %v94_v18 = vsel %vm83_vm0, %v52_v13, -inf  ;;  %1017 = vmatpush3.bf16.msra.mxu0 %v1014_v3  ;;  %v93_v21 = vmax.f32 %v91_v16, %v92_v17  ;;  %v22_v27 = vld [vmem:[%s1607_s3 + $0x18] sm:$0xff] }
   0x6   :  { %v89_v10 = vsel %vm83_vm0, %v67_v6, -inf  ;;  %v96_v22 = vsel %vm83_vm0, %v68_v15, -inf  ;;  %v103_v31 = vsel %vm83_vm0, %v69_v24, -inf  ;;  %v38_v32 = vld [vmem:[%s1607_s3 + $0x98] sm:$0xff]  ;;  %v105_v36 = vsel %vm83_vm0, %v22_v27, -inf  ;;  %v23_v39 = vld [vmem:[%s1607_s3 + $0x20] sm:$0xff] }
   0x7   :  { %v88_v28 = vmax.f32 %v86_v14, %v87_v9  ;;  %v54_v33 = vld [vmem:[%s1607_s3 + $0x118] sm:$0xff]  ;;  %v95_v35 = vmax.f32 %v93_v21, %v94_v18  ;;  %v106_v37 = vsel %vm83_vm0, %v38_v32, -inf  ;;  %v39_v40 = vld [vmem:[%s1607_s3 + $0xa0] sm:$0xff]  ;;  %v102_v43 = vmax.f32 %v100_v29, %v101_v30  ;;  %v24_v47 = vld [vmem:[%s1607_s3 + $0x28] sm:$0xff] }
   0x8   :  { %v70_v34 = vld [vmem:[%s1607_s3 + $0x198] sm:$0xff]  ;;  %v108_v38 = vsel %vm83_vm0, %v54_v33, -inf  ;;  %v55_v41 = vld [vmem:[%s1607_s3 + $0x120] sm:$0xff]  ;;  %v107_v44 = vmax.f32 %v105_v36, %v106_v37  ;;  %v40_v48 = vld [vmem:[%s1607_s3 + $0xa8] sm:$0xff]  ;;  %v112_v50 = vsel %vm83_vm0, %v23_v39, -inf  ;;  %v113_v51 = vsel %vm83_vm0, %v39_v40, -inf }
   0x9   :  { %v90_v42 = vmax.f32 %v88_v28, %v89_v10  ;;  %v110_v45 = vsel %vm83_vm0, %v70_v34, -inf  ;;  %v71_v46 = vld [vmem:[%s1607_s3 + $0x1a0] sm:$0xff]  ;;  %v97_v49 = vmax.f32 %v95_v35, %v96_v22  ;;  %v115_v52 = vsel %vm83_vm0, %v55_v41, -inf  ;;  %v56_v57 = vld [vmem:[%s1607_s3 + $0x128] sm:$0xff]  ;;  %v25_v63 = vld [vmem:[%s1607_s3 + $0x30] sm:$0xff] }
   0xa   :  { %v104_v54 = vmax.f32 %v102_v43, %v103_v31  ;;  %v109_v55 = vmax.f32 %v107_v44, %v108_v38  ;;  %v114_v56 = vmax.f32 %v112_v50, %v113_v51  ;;  %v72_v58 = vld [vmem:[%s1607_s3 + $0x1a8] sm:$0xff]  ;;  %v117_v60 = vsel %vm83_vm0, %v71_v46, -inf  ;;  %v41_v3 = vld [vmem:[%s1607_s3 + $0xb0] sm:$0xff]  ;;  %v26_v9 = vld [vmem:[%s1607_s3 + $0x38] sm:$0xff] }
   0xb   :  { %v780_v53 = vmul.f32 -1.442695, %v90_v42  ;;  %v781_v59 = vmul.f32 -1.442695, %v97_v49  ;;  %v119_v61 = vsel %vm83_vm0, %v24_v47, -inf  ;;  %v120_v62 = vsel %vm83_vm0, %v40_v48, -inf }
   0xc   :  { %v782_v0 = vmul.f32 -1.442695, %v104_v54  ;;  %v111_v1 = vmax.f32 %v109_v55, %v110_v45  ;;  %v116_v2 = vmax.f32 %v114_v56, %v115_v52  ;;  %v57_v4 = vld [vmem:[%s1607_s3 + $0x130] sm:$0xff]  ;;  %v121_v6 = vmax.f32 %v119_v61, %v120_v62  ;;  %v42_v13 = vld [vmem:[%s1607_s3 + $0xb8] sm:$0xff]  ;;  %v27_v20 = vld [vmem:[%s1607_s3 + $0x40] sm:$0xff] }
   0xd   :  { %1078 = vpow2.f32 %v780_v53  ;;  %v73_v5 = vld [vmem:[%s1607_s3 + $0x1b0] sm:$0xff]  ;;  %v122_v7 = vsel %vm83_vm0, %v56_v57, -inf  ;;  %v124_v8 = vsel %vm83_vm0, %v72_v58, -inf  ;;  %v126_v12 = vsel %vm83_vm0, %v25_v63, -inf  ;;  %v58_v14 = vld [vmem:[%s1607_s3 + $0x138] sm:$0xff]  ;;  %v43_v24 = vld [vmem:[%s1607_s3 + $0xc0] sm:$0xff] }
   0xe   :  { %1080 = vpow2.f32 %v781_v59  ;;  %v783_v10 = vmul.f32 -1.442695, %v111_v1  ;;  %v118_v11 = vmax.f32 %v116_v2, %v117_v60  ;;  %v74_v15 = vld [vmem:[%s1607_s3 + $0x1b8] sm:$0xff]  ;;  %v123_v16 = vmax.f32 %v121_v6, %v122_v7  ;;  %v59_v25 = vld [vmem:[%s1607_s3 + $0x140] sm:$0xff]  ;;  %v28_v31 = vld [vmem:[%s1607_s3 + $0x48] sm:$0xff] }
   0xf   :  { %1082 = vpow2.f32 %v782_v0  ;;  %v127_v17 = vsel %vm83_vm0, %v41_v3, -inf  ;;  %v129_v18 = vsel %vm83_vm0, %v57_v4, -inf  ;;  %v131_v19 = vsel %vm83_vm0, %v73_v5, -inf  ;;  %v75_v26 = vld [vmem:[%s1607_s3 + $0x1c0] sm:$0xff]  ;;  %v44_v35 = vld [vmem:[%s1607_s3 + $0xc8] sm:$0xff]  ;;  %v29_v46 = vld [vmem:[%s1607_s3 + $0x50] sm:$0xff] }
  0x10   :  { %1084 = vpow2.f32 %v783_v10  ;;  %v784_v21 = vmul.f32 -1.442695, %v118_v11  ;;  %v128_v22 = vmax.f32 %v126_v12, %v127_v17  ;;  %v133_v23 = vsel %vm83_vm0, %v26_v9, -inf  ;;  %v60_v36 = vld [vmem:[%s1607_s3 + $0x148] sm:$0xff]  ;;  %v45_v47 = vld [vmem:[%s1607_s3 + $0xd0] sm:$0xff]  ;;  %v30_v63 = vld [vmem:[%s1607_s3 + $0x58] sm:$0xff] }
  0x11   :  { %v125_v27 = vmax.f32 %v123_v16, %v124_v8  ;;  %v134_v28 = vsel %vm83_vm0, %v42_v13, -inf  ;;  %v136_v29 = vsel %vm83_vm0, %v58_v14, -inf  ;;  %v138_v30 = vsel %vm83_vm0, %v74_v15, -inf  ;;  %v76_v37 = vld [vmem:[%s1607_s3 + $0x1c8] sm:$0xff]  ;;  %v61_v48 = vld [vmem:[%s1607_s3 + $0x150] sm:$0xff]  ;;  %v46_v7 = vld [vmem:[%s1607_s3 + $0xd8] sm:$0xff] }
  0x12   :  { %1086 = vpow2.f32 %v784_v21  ;;  %v130_v32 = vmax.f32 %v128_v22, %v129_v18  ;;  %v135_v33 = vmax.f32 %v133_v23, %v134_v28  ;;  %v140_v34 = vsel %vm83_vm0, %v27_v20, -inf  ;;  %v77_v59 = vld [vmem:[%s1607_s3 + $0x1d0] sm:$0xff]  ;;  %v62_v8 = vld [vmem:[%s1607_s3 + $0x158] sm:$0xff]  ;;  %v31_v17 = vld [vmem:[%s1607_s3 + $0x60] sm:$0xff] }
  0x13   :  { %v785_v38 = vmul.f32 -1.442695, %v125_v27  ;;  %v141_v39 = vsel %vm83_vm0, %v43_v24, -inf  ;;  %v143_v40 = vsel %vm83_vm0, %v59_v25, -inf  ;;  %v145_v41 = vsel %vm83_vm0, %v75_v26, -inf  ;;  %v78_v9 = vld [vmem:[%s1607_s3 + $0x1d8] sm:$0xff] }
  0x14   :  { %v132_v42 = vmax.f32 %v130_v32, %v131_v19  ;;  %v137_v43 = vmax.f32 %v135_v33, %v136_v29  ;;  %v142_v44 = vmax.f32 %v140_v34, %v141_v39  ;;  %v147_v45 = vsel %vm83_vm0, %v28_v31, -inf  ;;  %v47_v18 = vld [vmem:[%s1607_s3 + $0xe0] sm:$0xff]  ;;  %v32_v31 = vld [vmem:[%s1607_s3 + $0x68] sm:$0xff] }
  0x15   :  { %1088 = vpow2.f32 %v785_v38  ;;  %v148_v49 = vsel %vm83_vm0, %v44_v35, -inf  ;;  %v150_v50 = vsel %vm83_vm0, %v60_v36, -inf  ;;  %v152_v51 = vsel %vm83_vm0, %v76_v37, -inf  ;;  %v63_v23 = vld [vmem:[%s1607_s3 + $0x160] sm:$0xff]  ;;  %v48_v32 = vld [vmem:[%s1607_s3 + $0xe8] sm:$0xff] }
  0x16   :  { %v786_v53 = vmul.f32 -1.442695, %v132_v42  ;;  %v139_v54 = vmax.f32 %v137_v43, %v138_v30  ;;  %v144_v55 = vmax.f32 %v142_v44, %v143_v40  ;;  %v149_v56 = vmax.f32 %v147_v45, %v148_v49  ;;  %v79_v27 = vld [vmem:[%s1607_s3 + $0x1e0] sm:$0xff]  ;;  %v64_v37 = vld [vmem:[%s1607_s3 + $0x168] sm:$0xff]  ;;  %v33_v42 = vld [vmem:[%s1607_s3 + $0x70] sm:$0xff] }
  0x17   :  { %v1079_v52 = vpop.eup %1078  ;;  %v154_v60 = vsel %vm83_vm0, %v29_v46, -inf  ;;  %v155_v61 = vsel %vm83_vm0, %v45_v47, -inf  ;;  %v157_v62 = vsel %vm83_vm0, %v61_v48, -inf  ;;  %v159_v12 = vsel %vm83_vm0, %v77_v59, -inf  ;;  %v49_v46 = vld [vmem:[%s1607_s3 + $0xf0] sm:$0xff]  ;;  %v50_v59 = vld [vmem:[%s1607_s3 + $0xf8] sm:$0xff] }
  0x18   :  { %v1081_v57 = vpop.eup %1080  ;;  %v244_v58 = vadd.f32 1.0, %v1079_v52  ;;  %1090 = vpow2.f32 %v786_v53  ;;  %v787_v2 = vmul.f32 -1.442695, %v139_v54  ;;  %v146_v3 = vmax.f32 %v144_v55, %v145_v41  ;;  %v80_v41 = vld [vmem:[%s1607_s3 + $0x1e8] sm:$0xff]  ;;  %v65_v47 = vld [vmem:[%s1607_s3 + $0x170] sm:$0xff] }
  0x19   :  { %v1083_v0 = vpop.eup %1082  ;;  %v245_v1 = vadd.f32 1.0, %v1081_v57  ;;  %v151_v5 = vmax.f32 %v149_v56, %v150_v50  ;;  %v156_v6 = vmax.f32 %v154_v60, %v155_v61  ;;  %v161_v13 = vsel %vm83_vm0, %v30_v63, -inf  ;;  %v81_v52 = vld [vmem:[%s1607_s3 + $0x1f0] sm:$0xff] }
  0x1a   :  { %1092 = vrcp.f32 %v244_v58  ;;  %v246_v4 = vadd.f32 1.0, %v1083_v0  ;;  %v1085_v10 = vpop.eup %1084  ;;  %v788_v11 = vmul.f32 -1.442695, %v146_v3  ;;  %v162_v20 = vsel %vm83_vm0, %v46_v7, -inf  ;;  %v34_v58 = vld [vmem:[%s1607_s3 + $0x78] sm:$0xff] }
  0x1b   :  { %1094 = vrcp.f32 %v245_v1  ;;  %v247_v14 = vadd.f32 1.0, %v1085_v10  ;;  %v153_v15 = vmax.f32 %v151_v5, %v152_v51  ;;  %v158_v16 = vmax.f32 %v156_v6, %v157_v62  ;;  %v66_v5 = vld [vmem:[%s1607_s3 + $0x178] sm:$0xff] }
  0x1c   :  { %1096 = vrcp.f32 %v246_v4  ;;  %v1087_v19 = vpop.eup %1086  ;;  %v164_v21 = vsel %vm83_vm0, %v62_v8, -inf  ;;  %v166_v22 = vsel %vm83_vm0, %v78_v9, -inf  ;;  %v163_v28 = vmax.f32 %v161_v13, %v162_v20  ;;  %v82_v6 = vld [vmem:[%s1607_s3 + $0x1f8] sm:$0xff] }
  0x1d   :  { %1098 = vpow2.f32 %v787_v2  ;;  %v248_v24 = vadd.f32 1.0, %v1087_v19  ;;  %v789_v25 = vmul.f32 -1.442695, %v153_v15  ;;  %v160_v26 = vmax.f32 %v158_v16, %v159_v12 }
  0x1e   :  { %1100 = vrcp.f32 %v247_v14  ;;  %v168_v29 = vsel %vm83_vm0, %v31_v17, -inf  ;;  %v169_v30 = vsel %vm83_vm0, %v47_v18, -inf  ;;  %v171_v36 = vsel %vm83_vm0, %v63_v23, -inf }
  0x1f   :  { %1102 = vpow2.f32 %v788_v11  ;;  %v1089_v33 = vpop.eup %1088  ;;  %v790_v34 = vmul.f32 -1.442695, %v160_v26  ;;  %v170_v35 = vmax.f32 %v168_v29, %v169_v30  ;;  %v165_v39 = vmax.f32 %v163_v28, %v164_v21 }
  0x20   :  { %1104 = vrcp.f32 %v248_v24  ;;  %v249_v38 = vadd.f32 1.0, %v1089_v33  ;;  %v173_v40 = vsel %vm83_vm0, %v79_v27, -inf  ;;  %v175_v44 = vsel %vm83_vm0, %v32_v31, -inf }
  0x21   :  { %1106 = vpow2.f32 %v789_v25  ;;  %v172_v43 = vmax.f32 %v170_v35, %v171_v36  ;;  %v176_v45 = vsel %vm83_vm0, %v48_v32, -inf  ;;  %v167_v49 = vmax.f32 %v165_v39, %v166_v22 }
  0x22   :  { %1108 = vpow2.f32 %v790_v34  ;;  %v1091_v48 = vpop.eup %1090  ;;  %v177_v50 = vmax.f32 %v175_v44, %v176_v45  ;;  %v178_v51 = vsel %vm83_vm0, %v64_v37, -inf  ;;  %v180_v56 = vsel %vm83_vm0, %v80_v41, -inf }
  0x23   :  { %1110 = vrcp.f32 %v249_v38  ;;  %v250_v54 = vadd.f32 1.0, %v1091_v48  ;;  %v174_v55 = vmax.f32 %v172_v43, %v173_v40  ;;  %v182_v57 = vsel %vm83_vm0, %v33_v42, -inf }
  0x24   :  { %v1093_v53 = vpop.eup %1092  ;;  %v791_v61 = vmul.f32 -1.442695, %v167_v49  ;;  %v179_v62 = vmax.f32 %v177_v50, %v178_v51  ;;  %v183_v63 = vsel %vm83_vm0, %v49_v46, -inf  ;;  %v185_v0 = vsel %vm83_vm0, %v65_v47, -inf  ;;  %v487_v51 = vld [vmem:[%s1608_s1] sm:$0xff] }
  0x25   :  { %v1095_v60 = vpop.eup %1094  ;;  %899 = vmatprep.mubr.msk.f32.mxu0 %vm83_vm0, %v1093_v53  ;;  %1112 = vrcp.f32 %v250_v54  ;;  %v792_v2 = vmul.f32 -1.442695, %v174_v55  ;;  %v184_v3 = vmax.f32 %v182_v57, %v183_v63  ;;  %v187_v4 = vsel %vm83_vm0, %v81_v52, -inf  ;;  %955 = vmatprep.mubr.f32.mxu1 %v487_v51 }
  0x26   :  { %v1097_v1 = vpop.eup %1096  ;;  %900 = vmatmul.mubr.msk.f32.vlgmr.msra.gmra.mrb[0].mxu0 %vm83_vm0, %v1095_v60  ;;  %1114 = vpow2.f32 %v791_v61  ;;  %v181_v8 = vmax.f32 %v179_v62, %v180_v56  ;;  %v189_v9 = vsel %vm83_vm0, %v34_v58, -inf  ;;  %v190_v10 = vsel %vm83_vm0, %v50_v59, -inf }
  0x27   :  { %v1099_v7 = vpop.eup %1098  ;;  %902 = vmatprep.mubr.msk.f32.mxu0 %vm83_vm0, %v1097_v1  ;;  %1116 = vpow2.f32 %v792_v2  ;;  %v186_v13 = vmax.f32 %v184_v3, %v185_v0  ;;  %v191_v14 = vmax.f32 %v189_v9, %v190_v10  ;;  %v192_v17 = vsel %vm83_vm0, %v66_v5, -inf }
  0x28   :  { %v1101_v11 = vpop.eup %1100  ;;  %v251_v12 = vadd.f32 1.0, %v1099_v7  ;;  %v793_v16 = vmul.f32 -1.442695, %v181_v8  ;;  %v194_v18 = vsel %vm83_vm0, %v82_v6, -inf }
  0x29   :  { %v1103_v15 = vpop.eup %1102  ;;  %v188_v21 = vmax.f32 %v186_v13, %v187_v4  ;;  %v193_v22 = vmax.f32 %v191_v14, %v192_v17  ;;  %v489_v13 = vld [vmem:[%s1608_s1 + $0x10] sm:$0xff]  ;;  %v490_v14 = vld [vmem:[%s1608_s1 + $0x18] sm:$0xff] }
  0x2a   :  { %v1105_v19 = vpop.eup %1104  ;;  %903 = vmatmul.mubr.msk.f32.gmra.mrb[2].mxu0 %vm83_vm0, %v1101_v11  ;;  %1118 = vrcp.f32 %v251_v12  ;;  %v252_v20 = vadd.f32 1.0, %v1103_v15  ;;  %v488_v12 = vld [vmem:[%s1608_s1 + $0x8] sm:$0xff]  ;;  %v491_v15 = vld [vmem:[%s1608_s1 + $0x20] sm:$0xff]  ;;  %v493_v17 = vld [vmem:[%s1608_s1 + $0x30] sm:$0xff] }
  0x2b   :  { %v1107_v23 = vpop.eup %1106  ;;  %905 = vmatprep.mubr.msk.f32.mxu0 %vm83_vm0, %v1105_v19  ;;  %1120 = vpow2.f32 %v793_v16  ;;  %v794_v26 = vmul.f32 -1.442695, %v188_v21  ;;  %v195_v27 = vmax.f32 %v193_v22, %v194_v18  ;;  %v492_v16 = vld [vmem:[%s1608_s1 + $0x28] sm:$0xff]  ;;  %v494_v18 = vld [vmem:[%s1608_s1 + $0x38] sm:$0xff]  ;;  %v495_v19 = vld [vmem:[%s1608_s1 + $0x40] sm:$0xff] }
  0x2c   :  { %v1109_v24 = vpop.eup %1108  ;;  %1122 = vrcp.f32 %v252_v20  ;;  %v253_v25 = vadd.f32 1.0, %v1107_v23  ;;  %v496_v20 = vld [vmem:[%s1608_s1 + $0x48] sm:$0xff]  ;;  %v497_v21 = vld [vmem:[%s1608_s1 + $0x50] sm:$0xff]  ;;  %v498_v22 = vld [vmem:[%s1608_s1 + $0x58] sm:$0xff] }
  0x2d   :  { %v1111_v28 = vpop.eup %1110  ;;  %v254_v29 = vadd.f32 1.0, %v1109_v24  ;;  %v795_v30 = vmul.f32 -1.442695, %v195_v27  ;;  %v499_v23 = vld [vmem:[%s1608_s1 + $0x60] sm:$0xff]  ;;  %v500_v24 = vld [vmem:[%s1608_s1 + $0x68] sm:$0xff]  ;;  %v1142_v27 = vmov 0.0|0.0  }
  0x2e   :  { %906 = vmatmul.mubr.msk.f32.gmra.mrb[4].mxu0 %vm83_vm0, %v1111_v28  ;;  %1124 = vrcp.f32 %v253_v25  ;;  %v501_v25 = vld [vmem:[%s1608_s1 + $0x70] sm:$0xff]  ;;  %1050 = vmatprep.subr.bf16.mxu0 %v1142_v27  ;;  %v1144_v28 = vmov 0.0  }
  0x2f   :  { %1126 = vrcp.f32 %v254_v29  ;;  %v1113_v31 = vpop.eup %1112 }
  0x30   :  { %1128 = vpow2.f32 %v794_v26  ;;  %v1115_v32 = vpop.eup %1114  ;;  %908 = vmatprep.mubr.msk.f32.mxu0 %vm83_vm0, %v1113_v31  ;;  %v502_v26 = vld [vmem:[%s1608_s1 + $0x78] sm:$0xff] }
  0x31   :  { %1130 = vpow2.f32 %v795_v30  ;;  %v1117_v33 = vpop.eup %1116  ;;  %v255_v34 = vadd.f32 1.0, %v1115_v32 }
  0x32   :  { %v256_v35 = vadd.f32 1.0, %v1117_v33 }
  0x33   :  { %1132 = vrcp.f32 %v255_v34  ;;  %v1145_v34 = vmov 1.0|1.0  }
  0x34   :  { %v1119_v36 = vpop.eup %1118  ;;  %1134 = vrcp.f32 %v256_v35 }
  0x35   :  { %v1121_v37 = vpop.eup %1120  ;;  %909 = vmatmul.mubr.msk.f32.gmra.mrb[6].mxu0 %vm83_vm0, %v1119_v36 }
  0x36   :  { %v1123_v38 = vpop.eup %1122  ;;  %v257_v39 = vadd.f32 1.0, %v1121_v37 }
  0x37   :  { %911 = vmatprep.mubr.msk.f32.mxu0 %vm83_vm0, %v1123_v38 }
  0x38   :  { %v1125_v40 = vpop.eup %1124  ;;  %1136 = vrcp.f32 %v257_v39 }
  0x39   :  { %v1127_v41 = vpop.eup %1126  ;;  %912 = vmatmul.mubr.msk.f32.gmra.mrb[8].mxu0 %vm83_vm0, %v1125_v40 }
  0x3a   :  { %v1129_v42 = vpop.eup %1128  ;;  %914 = vmatprep.mubr.msk.f32.mxu0 %vm83_vm0, %v1127_v41 }
  0x3b   :  { %v1131_v43 = vpop.eup %1130  ;;  %v258_v44 = vadd.f32 1.0, %v1129_v42 }
  0x3c   :  { %v259_v45 = vadd.f32 1.0, %v1131_v43 }
  0x3d   :  { %1138 = vrcp.f32 %v258_v44  ;;  %v1133_v46 = vpop.eup %1132 }
  0x3e   :  { %1140 = vrcp.f32 %v259_v45  ;;  %v1135_v47 = vpop.eup %1134  ;;  %915 = vmatmul.mubr.msk.f32.gmra.mrb[10].mxu0 %vm83_vm0, %v1133_v46 }
  0x3f   :  { %917 = vmatprep.mubr.msk.f32.mxu0 %vm83_vm0, %v1135_v47 }
  0x42   :  { %v1137_v48 = vpop.eup %1136 }
  0x43   :  { %918 = vmatmul.mubr.msk.f32.gmra.mrb[12].mxu0 %vm83_vm0, %v1137_v48 }
  0x47   :  { %v1139_v49 = vpop.eup %1138 }
  0x48   :  { %v1141_v50 = vpop.eup %1140  ;;  %920 = vmatprep.mubr.msk.f32.mxu0 %vm83_vm0, %v1139_v49 }
  0x49   :  { %921 = vmatmul.mubr.msk.f32.gmra.mrb[14].mxu0 %vm83_vm0, %v1141_v50 }
  0x4a   :  { %1011 = vmatprep.mubr.msk.f32.mxu0 %vm1143_vm1, %v1144_v28 }
  0xf9   :  { %v901_v52 = vpop.f32.mrb[0].mxu0 }
  0xfa   :  { %v408_v53 = vpop.f32.mrb[1].mxu0 }
  0xfb   :  { %v1018_v54 = vpack.c.bf16 %v901_v52, %v408_v53 }
  0xfd   :  { %v904_v55 = vpop.f32.mrb[2].mxu0  ;;  %1019 = vmatprep.subr.bf16.mxu1 %v1018_v54 }
  0xfe   :  { %v418_v56 = vpop.f32.mrb[3].mxu0  ;;  %1021 = vmatpush3.bf16.msra.mxu1 %v1018_v54 }
  0xff   :  { %v1022_v57 = vpack.c.bf16 %v904_v55, %v418_v56 }
 0x101   :  { %v907_v58 = vpop.f32.mrb[4].mxu0  ;;  %1023 = vmatprep.subr.bf16.mxu1 %v1022_v57 }
 0x102   :  { %v428_v59 = vpop.f32.mrb[5].mxu0  ;;  %1025 = vmatpush3.bf16.msra.mxu1 %v1022_v57 }
 0x103   :  { %v1026_v60 = vpack.c.bf16 %v907_v58, %v428_v59 }
 0x105   :  { %1027 = vmatprep.subr.bf16.mxu1 %v1026_v60 }
 0x106   :  { %1029 = vmatpush3.bf16.msra.mxu1 %v1026_v60 }
 0x108   :  { %v910_v61 = vpop.f32.mrb[6].mxu0 }
 0x109   :  { %v438_v62 = vpop.f32.mrb[7].mxu0 }
 0x10a   :  { %v1030_v63 = vpack.c.bf16 %v910_v61, %v438_v62  ;;  %v696_v62 = vld [vmem:[%s1610_s2] sm:$0xff] }
 0x10c   :  { %v913_v0 = vpop.f32.mrb[8].mxu0  ;;  %1031 = vmatprep.subr.bf16.mxu1 %v1030_v63 }
 0x10d   :  { %v448_v1 = vpop.f32.mrb[9].mxu0  ;;  %1033 = vmatpush3.bf16.msra.mxu1 %v1030_v63 }
 0x10e   :  { %v1034_v2 = vpack.c.bf16 %v913_v0, %v448_v1 }
 0x110   :  { %1035 = vmatprep.subr.bf16.mxu1 %v1034_v2 }
 0x111   :  { %1037 = vmatpush3.bf16.msra.mxu1 %v1034_v2  ;;  %v916_v3 = vpop.f32.mrb[10].mxu0 }
 0x112   :  { %v458_v4 = vpop.f32.mrb[11].mxu0 }
 0x113   :  { %v1038_v5 = vpack.c.bf16 %v916_v3, %v458_v4 }
 0x115   :  { %1039 = vmatprep.subr.bf16.mxu1 %v1038_v5 }
 0x116   :  { %v919_v6 = vpop.f32.mrb[12].mxu0  ;;  %1041 = vmatpush3.bf16.msra.mxu1 %v1038_v5 }
 0x117   :  { %v468_v7 = vpop.f32.mrb[13].mxu0 }
 0x118   :  { %v1042_v8 = vpack.c.bf16 %v919_v6, %v468_v7 }
 0x11a   :  { %1043 = vmatprep.subr.bf16.mxu1 %v1042_v8 }
 0x11b   :  { %1045 = vmatpush3.bf16.msra.mxu1 %v1042_v8 }
 0x11c   :  { %v922_v9 = vpop.f32.mrb[14].mxu0 }
 0x11d   :  { %v478_v10 = vpop.f32.mrb[15].mxu0 }
 0x11e   :  { %v1046_v11 = vpack.c.bf16 %v922_v9, %v478_v10 }
 0x120   :  { %1047 = vmatprep.subr.bf16.mxu1 %v1046_v11 }
 0x121   :  { %1049 = vmatpush3.bf16.msra.mxu1 %v1046_v11 }
 0x124   :  { %956 = vmatmul.mubr.f32.vlgmr.msra.gmra.mrb[0].mxu1 %v488_v12 }
 0x125   :  { %958 = vmatprep.mubr.f32.mxu1 %v489_v13 }
 0x128   :  { %959 = vmatmul.mubr.f32.gmra.mrb[2].mxu1 %v490_v14 }
 0x129   :  { %961 = vmatprep.mubr.f32.mxu1 %v491_v15 }
 0x12c   :  { %962 = vmatmul.mubr.f32.gmra.mrb[4].mxu1 %v492_v16 }
 0x12d   :  { %964 = vmatprep.mubr.f32.mxu1 %v493_v17 }
 0x130   :  { %965 = vmatmul.mubr.f32.gmra.mrb[6].mxu1 %v494_v18 }
 0x131   :  { %967 = vmatprep.mubr.f32.mxu1 %v495_v19 }
 0x134   :  { %968 = vmatmul.mubr.f32.gmra.mrb[8].mxu1 %v496_v20 }
 0x135   :  { %970 = vmatprep.mubr.f32.mxu1 %v497_v21 }
 0x138   :  { %971 = vmatmul.mubr.f32.gmra.mrb[10].mxu1 %v498_v22 }
 0x139   :  { %973 = vmatprep.mubr.f32.mxu1 %v499_v23 }
 0x13c   :  { %974 = vmatmul.mubr.f32.gmra.mrb[12].mxu1 %v500_v24 }
 0x13d   :  { %976 = vmatprep.mubr.f32.mxu1 %v501_v25 }
 0x140   :  { %977 = vmatmul.mubr.f32.gmra.mrb[14].mxu1 %v502_v26 }
 0x1f7   :  { %v957_v29 = vpop.f32.mrb[0].mxu1 }
 0x1f8   :  { %vm649_vm2 = vcmp.gt.f32.partialorder %v957_v29, 0.01  ;;  %v569_v30 = vpop.f32.mrb[1].mxu1 }
 0x1f9   :  { %v665_v31 = vsel %vm649_vm2, 1.0, %v1144_v28  ;;  %vm648_vm3 = vcmp.gt.f32.partialorder %v569_v30, 0.01 }
 0x1fa   :  { %681 = vst.msk [vmem:[%s1609_s4 + $0x8] sm:$0xff] %vm83_vm0, %v665_v31  ;;  %v664_v32 = vsel %vm648_vm3, 1.0, %v1144_v28  ;;  %vm1051_vm4 = vmpackc.low %vm649_vm2, %vm648_vm3 }
 0x1fb   :  { %680 = vst.msk [vmem:[%s1609_s4] sm:$0xff] %vm83_vm0, %v664_v32  ;;  %v960_v33 = vpop.f32.mrb[2].mxu1  ;;  %1052 = vmatpush3.bf16.msk.msra.mxu0 %vm1051_vm4, %v1145_v34 }
 0x1fc   :  { %vm651_vm5 = vcmp.gt.f32.partialorder %v960_v33, 0.01  ;;  %v579_v35 = vpop.f32.mrb[3].mxu1  ;;  %1053 = vmatprep.subr.bf16.mxu0 %v1142_v27 }
 0x1fd   :  { %v667_v36 = vsel %vm651_vm5, 1.0, %v1144_v28  ;;  %vm650_vm6 = vcmp.gt.f32.partialorder %v579_v35, 0.01 }
 0x1fe   :  { %683 = vst.msk [vmem:[%s1609_s4 + $0x18] sm:$0xff] %vm83_vm0, %v667_v36  ;;  %v666_v37 = vsel %vm650_vm6, 1.0, %v1144_v28  ;;  %vm1054_vm7 = vmpackc.low %vm651_vm5, %vm650_vm6 }
 0x1ff   :  { %682 = vst.msk [vmem:[%s1609_s4 + $0x10] sm:$0xff] %vm83_vm0, %v666_v37  ;;  %v963_v38 = vpop.f32.mrb[4].mxu1  ;;  %1055 = vmatpush3.bf16.msk.msra.mxu0 %vm1054_vm7, %v1145_v34 }
 0x200   :  { %vm653_vm8 = vcmp.gt.f32.partialorder %v963_v38, 0.01  ;;  %v589_v39 = vpop.f32.mrb[5].mxu1  ;;  %1056 = vmatprep.subr.bf16.mxu0 %v1142_v27 }
 0x201   :  { %v669_v40 = vsel %vm653_vm8, 1.0, %v1144_v28  ;;  %vm652_vm9 = vcmp.gt.f32.partialorder %v589_v39, 0.01 }
 0x202   :  { %685 = vst.msk [vmem:[%s1609_s4 + $0x28] sm:$0xff] %vm83_vm0, %v669_v40  ;;  %v668_v41 = vsel %vm652_vm9, 1.0, %v1144_v28  ;;  %vm1057_vm10 = vmpackc.low %vm653_vm8, %vm652_vm9 }
 0x203   :  { %684 = vst.msk [vmem:[%s1609_s4 + $0x20] sm:$0xff] %vm83_vm0, %v668_v41  ;;  %v966_v42 = vpop.f32.mrb[6].mxu1  ;;  %1058 = vmatpush3.bf16.msk.msra.mxu0 %vm1057_vm10, %v1145_v34 }
 0x204   :  { %vm655_vm11 = vcmp.gt.f32.partialorder %v966_v42, 0.01  ;;  %v599_v43 = vpop.f32.mrb[7].mxu1  ;;  %1059 = vmatprep.subr.bf16.mxu0 %v1142_v27 }
 0x205   :  { %v671_v44 = vsel %vm655_vm11, 1.0, %v1144_v28  ;;  %vm654_vm12 = vcmp.gt.f32.partialorder %v599_v43, 0.01 }
 0x206   :  { %687 = vst.msk [vmem:[%s1609_s4 + $0x38] sm:$0xff] %vm83_vm0, %v671_v44  ;;  %v670_v45 = vsel %vm654_vm12, 1.0, %v1144_v28  ;;  %vm1060_vm13 = vmpackc.low %vm655_vm11, %vm654_vm12  ;;  %vm770_vm11 = vcmask 7168  }
 0x207   :  { %686 = vst.msk [vmem:[%s1609_s4 + $0x30] sm:$0xff] %vm83_vm0, %v670_v45  ;;  %v969_v46 = vpop.f32.mrb[8].mxu1  ;;  %1061 = vmatpush3.bf16.msk.msra.mxu0 %vm1060_vm13, %v1145_v34 }
 0x208   :  { %vm657_vm14 = vcmp.gt.f32.partialorder %v969_v46, 0.01  ;;  %v609_v47 = vpop.f32.mrb[9].mxu1  ;;  %1062 = vmatprep.subr.bf16.mxu0 %v1142_v27 }
 0x209   :  { %v673_v48 = vsel %vm657_vm14, 1.0, %v1144_v28  ;;  %vm656_vm15 = vcmp.gt.f32.partialorder %v609_v47, 0.01 }
 0x20a   :  { %689 = vst.msk [vmem:[%s1609_s4 + $0x48] sm:$0xff] %vm83_vm0, %v673_v48  ;;  %v672_v49 = vsel %vm656_vm15, 1.0, %v1144_v28  ;;  %vm1063_vm1 = vmpackc.low %vm657_vm14, %vm656_vm15 }
 0x20b   :  { %688 = vst.msk [vmem:[%s1609_s4 + $0x40] sm:$0xff] %vm83_vm0, %v672_v49  ;;  %v972_v50 = vpop.f32.mrb[10].mxu1  ;;  %1064 = vmatpush3.bf16.msk.msra.mxu0 %vm1063_vm1, %v1145_v34 }
 0x20c   :  { %vm659_vm2 = vcmp.gt.f32.partialorder %v972_v50, 0.01  ;;  %v619_v51 = vpop.f32.mrb[11].mxu1  ;;  %1065 = vmatprep.subr.bf16.mxu0 %v1142_v27 }
 0x20d   :  { %v675_v52 = vsel %vm659_vm2, 1.0, %v1144_v28  ;;  %vm658_vm3 = vcmp.gt.f32.partialorder %v619_v51, 0.01 }
 0x20e   :  { %691 = vst.msk [vmem:[%s1609_s4 + $0x58] sm:$0xff] %vm83_vm0, %v675_v52  ;;  %v674_v53 = vsel %vm658_vm3, 1.0, %v1144_v28  ;;  %vm1066_vm4 = vmpackc.low %vm659_vm2, %vm658_vm3 }
 0x20f   :  { %690 = vst.msk [vmem:[%s1609_s4 + $0x50] sm:$0xff] %vm83_vm0, %v674_v53  ;;  %v975_v54 = vpop.f32.mrb[12].mxu1  ;;  %1067 = vmatpush3.bf16.msk.msra.mxu0 %vm1066_vm4, %v1145_v34 }
 0x210   :  { %vm661_vm5 = vcmp.gt.f32.partialorder %v975_v54, 0.01  ;;  %v629_v55 = vpop.f32.mrb[13].mxu1  ;;  %1068 = vmatprep.subr.bf16.mxu0 %v1142_v27 }
 0x211   :  { %v677_v56 = vsel %vm661_vm5, 1.0, %v1144_v28  ;;  %vm660_vm6 = vcmp.gt.f32.partialorder %v629_v55, 0.01 }
 0x212   :  { %693 = vst.msk [vmem:[%s1609_s4 + $0x68] sm:$0xff] %vm83_vm0, %v677_v56  ;;  %v676_v57 = vsel %vm660_vm6, 1.0, %v1144_v28  ;;  %vm1069_vm7 = vmpackc.low %vm661_vm5, %vm660_vm6 }
 0x213   :  { %692 = vst.msk [vmem:[%s1609_s4 + $0x60] sm:$0xff] %vm83_vm0, %v676_v57  ;;  %v978_v58 = vpop.f32.mrb[14].mxu1  ;;  %1070 = vmatpush3.bf16.msk.msra.mxu0 %vm1069_vm7, %v1145_v34 }
 0x214   :  { %vm663_vm8 = vcmp.gt.f32.partialorder %v978_v58, 0.01  ;;  %v639_v59 = vpop.f32.mrb[15].mxu1  ;;  %1071 = vmatprep.subr.bf16.mxu0 %v1142_v27 }
 0x215   :  { %v679_v60 = vsel %vm663_vm8, 1.0, %v1144_v28  ;;  %vm662_vm9 = vcmp.gt.f32.partialorder %v639_v59, 0.01 }
 0x216   :  { %695 = vst.msk [vmem:[%s1609_s4 + $0x78] sm:$0xff] %vm83_vm0, %v679_v60  ;;  %v678_v61 = vsel %vm662_vm9, 1.0, %v1144_v28  ;;  %vm1072_vm10 = vmpackc.low %vm663_vm8, %vm662_vm9 }
 0x217   :  { %694 = vst.msk [vmem:[%s1609_s4 + $0x70] sm:$0xff] %vm83_vm0, %v678_v61  ;;  %1073 = vmatpush3.bf16.msk.msra.mxu0 %vm1072_vm10, %v1145_v34 }
 0x21a   :  { %1012 = vmatmul.mubr.f32.vlgmr.msra.gmra.mrb[16].mxu0 %v696_v62 }
 0x2ed   :  { %v763_v63 = vpop.f32.mrb[16].mxu0 }
 0x2ee   :  { %v1013_v0 = vpop.f32.mrb[17].mxu0  ;;  %v767_v1 = vsel %vm83_vm0, %v763_v63, 0.0 }
 0x2ef   :  { %768 = vadd.xlane.f32.xlu0 %v767_v1 }
 0x37c   :  { %v769_v2 = vpop.xlane.xlu0 %768 }
 0x37d   :  { %771 = vst.msk [vmem:[%s1611_s5] sm:$0xff] %vm770_vm11, %v769_v2 }

</bundles_post_ra>
